<compile_context>
chip_gen: v5e
topology: v5e:2x2
jax: 0.10.0
libtpu: 0.0.40
codegen_flags: <defaults>
</compile_context>

<pallas_src>
import jax
import jax.numpy as jnp
from jax.experimental import pallas as pl
from jax.experimental.pallas import tpu as pltpu

LANE = 128        # lane width (last dim)
MIN_TB = 16       # batch tile granularity (bf16 sublane packing)
HIDDEN = 256


def _round_up(x, m):
    return (x + m - 1) // m * m


# ---------------------------------------------------------------------------
# Kernel: fused 3-layer MLP on one (tb, S) batch tile.
# ---------------------------------------------------------------------------
def qnetwork_kernel(x_ref, w1_ref, b1_ref, w2_ref, b2_ref, w3_ref, b3_ref, o_ref):
    f32 = jnp.float32
    bf16 = jnp.bfloat16
    # fc1 + ReLU (cast the f32 input tile to bf16 in VMEM; f32 accumulate)
    x = x_ref[...].astype(bf16)
    h1 = jnp.dot(x, w1_ref[...], preferred_element_type=f32) + b1_ref[...]
    h1 = jnp.maximum(h1, 0.0).astype(bf16)
    # fc2 + ReLU
    h2 = jnp.dot(h1, w2_ref[...], preferred_element_type=f32) + b2_ref[...]
    h2 = jnp.maximum(h2, 0.0).astype(bf16)
    # fc3 (no activation) -> lane-dense padded output, cast on store
    o_ref[...] = (jnp.dot(h2, w3_ref[...], preferred_element_type=f32)
                  + b3_ref[...]).astype(o_ref.dtype)


# ---------------------------------------------------------------------------
# Tiling / VMEM sizing helpers
# ---------------------------------------------------------------------------
def _choose_tiling(B, tile_b):
    """Pick (B_pad, tb, n_steps): >=2 steps when batch is big enough (v7x
    megacore), tile derived from cdiv so padding never exceeds one MIN_TB
    granule per step."""
    B_pad = _round_up(max(B, MIN_TB), MIN_TB)
    if B_pad > tile_b:
        n_steps = pl.cdiv(B_pad, tile_b)
    elif B_pad >= 2 * MIN_TB:
        n_steps = 2
    else:
        n_steps = 1
    tb = _round_up(pl.cdiv(B_pad, n_steps), MIN_TB)
    B_pad = n_steps * tb
    return B_pad, tb, n_steps


def _vmem_limit_bytes(tb, S, A_pad, out_dtype):
    bf16, f32 = 2, 4
    out_b = jnp.dtype(out_dtype).itemsize
    weights = ((S * HIDDEN + HIDDEN * HIDDEN + HIDDEN * A_pad) * bf16
               + (2 * HIDDEN + A_pad) * f32)
    io = 2 * tb * S * f32 + 2 * tb * A_pad * out_b          # double-buffered tiles
    inter = 2 * tb * HIDDEN * (f32 + bf16)                  # h1/h2 f32 + bf16 copies
    est = 2 * weights + io + inter
    # generous headroom for compiler scratch, capped well below v7x's 64 MiB
    return min(2 * est + (2 << 20), 48 << 20)


# ---------------------------------------------------------------------------
# Wrapper
# ---------------------------------------------------------------------------
def qnetwork_forward(state, packed_params, action_size, *, tile_b=2048,
                     out_dtype=jnp.bfloat16, trim_output=True):
    """state: [B, state_size] float32. packed_params from pack_params()."""
    w1, b1, w2, b2, w3, b3 = packed_params
    B, S = state.shape
    assert w1.shape[0] == S
    A_pad = w3.shape[1]

    B_pad, tb, n_steps = _choose_tiling(B, tile_b)
    # Only row padding (cheap: S f32 per row); no lane pad / dtype-cast pass.
    x = state if B_pad == B else jnp.pad(state, ((0, B_pad - B), (0, 0)))

    out = pl.pallas_call(
        qnetwork_kernel,
        out_shape=jax.ShapeDtypeStruct((B_pad, A_pad), out_dtype),
        grid_spec=pltpu.PrefetchScalarGridSpec(
            num_scalar_prefetch=0,
            grid=(n_steps,),
            in_specs=[
                # activations: streamed over the batch grid axis
                pl.BlockSpec((tb, S), lambda i: (i, 0)),
                # weights / biases: constant block index -> stay VMEM-resident
                pl.BlockSpec((S, HIDDEN), lambda i: (0, 0)),
                pl.BlockSpec((1, HIDDEN), lambda i: (0, 0)),
                pl.BlockSpec((HIDDEN, HIDDEN), lambda i: (0, 0)),
                pl.BlockSpec((1, HIDDEN), lambda i: (0, 0)),
                pl.BlockSpec((HIDDEN, A_pad), lambda i: (0, 0)),
                pl.BlockSpec((1, A_pad), lambda i: (0, 0)),
            ],
            out_specs=pl.BlockSpec((tb, A_pad), lambda i: (i, 0)),
        ),
        compiler_params=pltpu.CompilerParams(
            dimension_semantics=("parallel",),   # shard batch steps across TCs (v7x)
            vmem_limit_bytes=_vmem_limit_bytes(tb, S, A_pad, out_dtype),
        ),
    )(x, w1, b1, w2, b2, w3, b3)

    if trim_output:
        # Downstream code that tolerates padded (B_pad, A_pad) Q-values can pass
        # trim_output=False and slice/mask at the argmax/loss instead.
        out = out[:B, :action_size]
    return out


# ---------------------------------------------------------------------------
# Parameter construction (PyTorch nn.Linear-style init, stored [in, out])
# ---------------------------------------------------------------------------
def init_params(key, state_size, action_size, hidden=HIDDEN):
    ks = jax.random.split(key, 6)

    def lin(kw, kb, fan_in, fan_out):
        bound = 1.0 / jnp.sqrt(jnp.float32(fan_in))
        w = jax.random.uniform(kw, (fan_in, fan_out), jnp.float32, -bound, bound)
        b = jax.random.uniform(kb, (1, fan_out), jnp.float32, -bound, bound)
        return w, b

    w1, b1 = lin(ks[0], ks[1], state_size, hidden)
    w2, b2 = lin(ks[2], ks[3], hidden, hidden)
    w3, b3 = lin(ks[4], ks[5], hidden, action_size)
    return (w1, b1, w2, b2, w3, b3)


def pack_params(params):
    """Weights -> bf16 (w1 stays unpadded [S,256]); action dim lane-padded to
    128 on w3/b3 so the output store is lane-dense; biases stay f32."""
    w1, b1, w2, b2, w3, b3 = params
    A = w3.shape[1]
    A_pad = _round_up(max(A, LANE), LANE)

    w1p = w1.astype(jnp.bfloat16)
    w2p = w2.astype(jnp.bfloat16)
    w3p = jnp.pad(w3, ((0, 0), (0, A_pad - A))).astype(jnp.bfloat16)
    b1p = b1.astype(jnp.float32)
    b2p = b2.astype(jnp.float32)
    b3p = jnp.pad(b3, ((0, 0), (0, A_pad - A))).astype(jnp.float32)
    return (w1p, b1p, w2p, b2p, w3p, b3p)


# ---------------------------------------------------------------------------
# Demo / correctness check
# ---------------------------------------------------------------------------
if __name__ == "__main__":
    key = jax.random.PRNGKey(0)
    k_param, k_state = jax.random.split(key)

    B, state_size, action_size = 8, 8, 4
    params = init_params(k_param, state_size, action_size)
    packed = pack_params(params)
    state = jax.random.normal(k_state, (B, state_size), jnp.float32)

    out = qnetwork_forward(state, packed, action_size)
    out = jax.block_until_ready(out)
    assert out.shape == (B, action_size)
    out_f32 = out.astype(jnp.float32)

    # Mirror of the kernel's bf16/f32 math in plain JAX (modest tolerance:
    # MXU accumulation order may differ slightly from XLA's dot).
    w1p, b1p, w2p, b2p, w3p, b3p = packed
    xb = state.astype(jnp.bfloat16)
    r1 = jnp.maximum(jnp.dot(xb, w1p, preferred_element_type=jnp.float32) + b1p, 0.0)
    r1 = r1.astype(jnp.bfloat16)
    r2 = jnp.maximum(jnp.dot(r1, w2p, preferred_element_type=jnp.float32) + b2p, 0.0)
    r2 = r2.astype(jnp.bfloat16)
    ref_mirror = (jnp.dot(r2, w3p, preferred_element_type=jnp.float32) + b3p)
    ref_mirror = ref_mirror[:, :action_size].astype(jnp.bfloat16).astype(jnp.float32)
    assert jnp.allclose(out_f32, ref_mirror, atol=2e-2, rtol=2e-2)

    # Looser check against the original full-f32 module semantics.
    w1, b1, w2, b2, w3, b3 = params
    ref_f32 = jnp.maximum(state @ w1 + b1, 0.0)
    ref_f32 = jnp.maximum(ref_f32 @ w2 + b2, 0.0)
    ref_f32 = ref_f32 @ w3 + b3
    assert jnp.allclose(out_f32, ref_f32, atol=6e-2, rtol=6e-2)

    # TODO(synk): predict/predict_q (host-side loops over numpy obs batches with
    # torch.sort) are not kernel work; call qnetwork_forward and do
    # jnp.argsort(..., descending) in plain JAX at the call site.

    print("KERNEL_OK")
</pallas_src>

<mosaic_0001>
module attributes {stable_mosaic.version = 11 : i64} {
  func.func @qnetwork_kernel(%arg0: i32, %arg1: memref<16x8xf32, #tpu.memory_space<vmem>>, %arg2: memref<8x256xbf16, #tpu.memory_space<vmem>>, %arg3: memref<1x256xf32, #tpu.memory_space<vmem>>, %arg4: memref<256x256xbf16, #tpu.memory_space<vmem>>, %arg5: memref<1x256xf32, #tpu.memory_space<vmem>>, %arg6: memref<256x128xbf16, #tpu.memory_space<vmem>>, %arg7: memref<1x128xf32, #tpu.memory_space<vmem>>, %arg8: memref<16x128xbf16, #tpu.memory_space<vmem>>) attributes {dimension_semantics = [#tpu.dimension_semantics<parallel>], iteration_bounds = array<i64: 1>, scalar_prefetch = 0 : i64, scratch_operands = 0 : i64, tpu.core_type = #tpu.core_type<tc>, window_params = [{transform_indices = @transform_0, window_bounds = array<i64: 16, 8>}, {pipeline_mode = #tpu.pipeline_mode<synchronous>, transform_indices = @transform_1, window_bounds = array<i64: 8, 256>}, {pipeline_mode = #tpu.pipeline_mode<synchronous>, transform_indices = @transform_2, window_bounds = array<i64: 1, 256>}, {pipeline_mode = #tpu.pipeline_mode<synchronous>, transform_indices = @transform_3, window_bounds = array<i64: 256, 256>}, {pipeline_mode = #tpu.pipeline_mode<synchronous>, transform_indices = @transform_4, window_bounds = array<i64: 1, 256>}, {pipeline_mode = #tpu.pipeline_mode<synchronous>, transform_indices = @transform_5, window_bounds = array<i64: 256, 128>}, {pipeline_mode = #tpu.pipeline_mode<synchronous>, transform_indices = @transform_6, window_bounds = array<i64: 1, 128>}, {transform_indices = @transform_7, window_bounds = array<i64: 16, 128>}]} {
    %c0 = arith.constant 0 : index
    %c0_0 = arith.constant 0 : index
    %0 = vector.load %arg1[%c0, %c0_0] : memref<16x8xf32, #tpu.memory_space<vmem>>, vector<16x8xf32>
    %1 = arith.truncf %0 : vector<16x8xf32> to vector<16x8xbf16>
    %c0_1 = arith.constant 0 : index
    %c0_2 = arith.constant 0 : index
    %2 = vector.load %arg2[%c0_1, %c0_2] : memref<8x256xbf16, #tpu.memory_space<vmem>>, vector<8x256xbf16>
    %cst = arith.constant dense<0.000000e+00> : vector<16x256xf32>
    %3 = tpu.matmul %1, %2, %cst {dimension_numbers = #tpu.dot_dimension_numbers<[1], [0], [0], [1], [0, 0, 1, 1], [], []>} : vector<16x8xbf16>, vector<8x256xbf16>, vector<16x256xf32> -> vector<16x256xf32>
    %c0_3 = arith.constant 0 : index
    %c0_4 = arith.constant 0 : index
    %4 = vector.load %arg3[%c0_3, %c0_4] : memref<1x256xf32, #tpu.memory_space<vmem>>, vector<1x256xf32>
    %5 = vector.broadcast %4 : vector<1x256xf32> to vector<16x256xf32>
    %6 = arith.addf %3, %5 : vector<16x256xf32>
    %cst_5 = arith.constant 0.000000e+00 : f32
    %7 = vector.broadcast %cst_5 : f32 to vector<16x256xf32>
    %8 = arith.maximumf %6, %7 : vector<16x256xf32>
    %9 = arith.truncf %8 : vector<16x256xf32> to vector<16x256xbf16>
    %c0_6 = arith.constant 0 : index
    %c0_7 = arith.constant 0 : index
    %10 = vector.load %arg4[%c0_6, %c0_7] : memref<256x256xbf16, #tpu.memory_space<vmem>>, vector<256x256xbf16>
    %cst_8 = arith.constant dense<0.000000e+00> : vector<16x256xf32>
    %11 = tpu.matmul %9, %10, %cst_8 {dimension_numbers = #tpu.dot_dimension_numbers<[1], [0], [0], [1], [0, 0, 1, 1], [], []>} : vector<16x256xbf16>, vector<256x256xbf16>, vector<16x256xf32> -> vector<16x256xf32>
    %c0_9 = arith.constant 0 : index
    %c0_10 = arith.constant 0 : index
    %12 = vector.load %arg5[%c0_9, %c0_10] : memref<1x256xf32, #tpu.memory_space<vmem>>, vector<1x256xf32>
    %13 = vector.broadcast %12 : vector<1x256xf32> to vector<16x256xf32>
    %14 = arith.addf %11, %13 : vector<16x256xf32>
    %cst_11 = arith.constant 0.000000e+00 : f32
    %15 = vector.broadcast %cst_11 : f32 to vector<16x256xf32>
    %16 = arith.maximumf %14, %15 : vector<16x256xf32>
    %17 = arith.truncf %16 : vector<16x256xf32> to vector<16x256xbf16>
    %c0_12 = arith.constant 0 : index
    %c0_13 = arith.constant 0 : index
    %18 = vector.load %arg6[%c0_12, %c0_13] : memref<256x128xbf16, #tpu.memory_space<vmem>>, vector<256x128xbf16>
    %cst_14 = arith.constant dense<0.000000e+00> : vector<16x128xf32>
    %19 = tpu.matmul %17, %18, %cst_14 {dimension_numbers = #tpu.dot_dimension_numbers<[1], [0], [0], [1], [0, 0, 1, 1], [], []>} : vector<16x256xbf16>, vector<256x128xbf16>, vector<16x128xf32> -> vector<16x128xf32>
    %c0_15 = arith.constant 0 : index
    %c0_16 = arith.constant 0 : index
    %20 = vector.load %arg7[%c0_15, %c0_16] : memref<1x128xf32, #tpu.memory_space<vmem>>, vector<1x128xf32>
    %21 = vector.broadcast %20 : vector<1x128xf32> to vector<16x128xf32>
    %22 = arith.addf %19, %21 : vector<16x128xf32>
    %23 = arith.truncf %22 : vector<16x128xf32> to vector<16x128xbf16>
    %c0_17 = arith.constant 0 : index
    %c0_18 = arith.constant 0 : index
    %24 = vector.load %arg8[%c0_17, %c0_18] : memref<16x128xbf16, #tpu.memory_space<vmem>>, vector<16x128xbf16>
    tpu.vector_store %arg8[%c0_17, %c0_18], %23 {strides = array<i32>} : memref<16x128xbf16, #tpu.memory_space<vmem>>, vector<16x128xbf16>,
    return
  }
  func.func @transform_0(%arg0: i32) -> (i32, i32) {
    %c0_i32 = arith.constant 0 : i32
    %c0_i32_0 = arith.constant 0 : i32
    return %arg0, %c0_i32 : i32, i32
  }
  func.func @transform_1(%arg0: i32) -> (i32, i32) {
    %c0_i32 = arith.constant 0 : i32
    %c0_i32_0 = arith.constant 0 : i32
    %c0_i32_1 = arith.constant 0 : i32
    return %c0_i32, %c0_i32_0 : i32, i32
  }
  func.func @transform_2(%arg0: i32) -> (i32, i32) {
    %c0_i32 = arith.constant 0 : i32
    %c0_i32_0 = arith.constant 0 : i32
    %c0_i32_1 = arith.constant 0 : i32
    return %c0_i32, %c0_i32_0 : i32, i32
  }
  func.func @transform_3(%arg0: i32) -> (i32, i32) {
    %c0_i32 = arith.constant 0 : i32
    %c0_i32_0 = arith.constant 0 : i32
    %c0_i32_1 = arith.constant 0 : i32
    return %c0_i32, %c0_i32_0 : i32, i32
  }
  func.func @transform_4(%arg0: i32) -> (i32, i32) {
    %c0_i32 = arith.constant 0 : i32
    %c0_i32_0 = arith.constant 0 : i32
    %c0_i32_1 = arith.constant 0 : i32
    return %c0_i32, %c0_i32_0 : i32, i32
  }
  func.func @transform_5(%arg0: i32) -> (i32, i32) {
    %c0_i32 = arith.constant 0 : i32
    %c0_i32_0 = arith.constant 0 : i32
    %c0_i32_1 = arith.constant 0 : i32
    return %c0_i32, %c0_i32_0 : i32, i32
  }
  func.func @transform_6(%arg0: i32) -> (i32, i32) {
    %c0_i32 = arith.constant 0 : i32
    %c0_i32_0 = arith.constant 0 : i32
    %c0_i32_1 = arith.constant 0 : i32
    return %c0_i32, %c0_i32_0 : i32, i32
  }
  func.func @transform_7(%arg0: i32) -> (i32, i32) {
    %c0_i32 = arith.constant 0 : i32
    %c0_i32_0 = arith.constant 0 : i32
    return %arg0, %c0_i32 : i32, i32
  }
}

</mosaic_0001>

<bundles_post_ra>
// kernel: tpu_custom_call.1
= control target key start
LH: loop header
LB: loop body
LE: loop exit
PB: predicated region body
PF: predicated region fallthrough
CT: control target
= control target key end

     0   :  { %12 = vsyncpa [#allocation3], 0  ;;  %s981_s0 = inlined_call_operand.vmem [shape: f32[16,8], index: 0, kind: input, shape index: {}]   ;;  %s982_s1 = inlined_call_operand.vmem [shape: bf16[8,256], index: 1, kind: input, shape index: {}]   ;;  %s983_s2 = inlined_call_operand.vmem [shape: f32[1,256], index: 2, kind: input, shape index: {}]   ;;  %s984_s3 = inlined_call_operand.hbm [shape: bf16[256,256], index: 3, kind: input, shape index: {}]   ;;  %s985_s4 = inlined_call_operand.vmem [shape: f32[1,256], index: 4, kind: input, shape index: {}]   ;;  %s986_s5 = inlined_call_operand.hbm [shape: bf16[256,128], index: 5, kind: input, shape index: {}]   ;;  %s987_s6 = inlined_call_operand.vmem [shape: f32[1,128], index: 6, kind: input, shape index: {}]   ;;  %s988_s7 = inlined_call_operand.hbm [shape: bf16[16,128], index: 7, kind: output, shape index: {}]  }
   0x1   :  { %13 = vsyncpa [#allocation6], 0 }
   0x2   :  { %14 = vsyncpa [#allocation4], 0  ;;  %s25_s26 = sshll.u32 %s984_s3, 4  ;;  %s897_s27 = smov [#allocation2]   ;;  %s26_s26 = int_to_ptr.hbm [resolvable:$true] %s25_s26 }
   0x3   :  { %s27_s28 = sshll.u32 %s897_s27, 4  ;;  %s40_s8 = sshll.u32 %s986_s5, 4  ;;  %s28_s28 = int_to_ptr.vmem [resolvable:$true] %s27_s28  ;;  %s41_s8 = int_to_ptr.hbm [resolvable:$true] %s40_s8 }
   0x4   :  { %s898_s9 = smov 128   ;;  %s899_s10 = smov 8  }
   0x5   :  { %33 = dma.hbm_to_vmem [thread:$0]  %s26_s26, 4096, %s28_s28, [#allocation3], %s898_s9, %s898_s9, %s899_s10  }
   0x6   :  { %s900_s11 = smov [#allocation5]   ;;  %s901_s13 = smov 64  }
   0x7   :  { %s42_s12 = sshll.u32 %s900_s11, 4  ;;  %s902_s14 = smov 4   ;;  %s43_s12 = int_to_ptr.vmem [resolvable:$true] %s42_s12 }
   0x8   :  { %48 = dma.hbm_to_vmem [thread:$0]  %s41_s8, 2048, %s43_s12, [#allocation6], %s901_s13, %s901_s13, %s902_s14  }
   0x9   :  { %891 = dma.done.wait [#allocation3], 4096  }
   0xa   :  { %892 = vsyncadd [#allocation3], 4294963200 }
   0xb   :  { %893 = dma.done.wait [#allocation6], 2048  }
   0xc   :  { %894 = vsyncadd [#allocation6], 4294965248  ;;  %v63_v0 = vld [vmem:[%s982_s1] sm:$0xff]  ;;  %vm79_vm0 = vcmask 1043456   ;;  %v61_v2 = vld [vmem:[%s981_s0 + $0x8] sm:$0xff]  ;;  %vm75_vm1 = vcmask 64512  }
   0xd   :  { %v60_v1 = vld [vmem:[%s981_s0] sm:$0xff]  ;;  %v71_v3 = vunpack.c.l.b16 %v63_v0  ;;  %v72_v4 = vunpack.c.h.b16 %v63_v0  ;;  %v624_v5 = vld [vmem:[#allocation2 + $0x70] sm:$0xf]  ;;  %v773_v6 = vld [vmem:[#allocation2 + $0x74] sm:$0xf0]  ;;  %s903_s21 = smov [#allocation7]  }
   0xe   :  { %v688_v7 = vld [vmem:[#allocation2 + $0xf0] sm:$0xf]  ;;  %v625_v8 = vor.u32 %v773_v6, %v624_v5  ;;  %v789_v9 = vld [vmem:[#allocation2 + $0xf4] sm:$0xf0]  ;;  %v772_v10 = vld [vmem:[#allocation2 + $0x74] sm:$0xf]  ;;  %v62_v25 = vpack.c.bf16 %v61_v2, %v60_v1 }
   0xf   :  { %v626_v11 = vld [vmem:[#allocation2 + $0x78] sm:$0xf0]  ;;  %v73_v12 = vpack.c.b16 %v71_v3, %v71_v3  ;;  %v74_v13 = vpack.c.b16 %v72_v4, %v72_v4  ;;  %v689_v14 = vor.u32 %v789_v9, %v688_v7  ;;  %v788_v16 = vld [vmem:[#allocation2 + $0xf4] sm:$0xf]  ;;  %v616_v18 = vld [vmem:[#allocation2 + $0x60] sm:$0xf] }
  0x10   :  { %v629_v15 = vor.u32 %v772_v10, %v626_v11  ;;  %v690_v17 = vld [vmem:[#allocation2 + $0xf8] sm:$0xf0]  ;;  %318 = vmatpush.bf16.msra.mxu2 %v625_v8  ;;  %v771_v20 = vld [vmem:[#allocation2 + $0x64] sm:$0xf0]  ;;  %v680_v21 = vld [vmem:[#allocation2 + $0xe0] sm:$0xf] }
  0x11   :  { %v693_v19 = vor.u32 %v788_v16, %v690_v17  ;;  %v787_v22 = vld [vmem:[#allocation2 + $0xe4] sm:$0xf0]  ;;  %v81_v23 = vsel %vm79_vm0, %v73_v12, 0  ;;  %v84_v24 = vsel %vm79_vm0, %v74_v13, 0  ;;  %332 = vmatpush.bf16.msra.mxu3 %v689_v14  ;;  %v617_v26 = vor.u32 %v771_v20, %v616_v18  ;;  %v770_v27 = vld [vmem:[#allocation2 + $0x64] sm:$0xf] }
  0x12   :  { %v618_v28 = vld [vmem:[#allocation2 + $0x68] sm:$0xf0]  ;;  %93 = vmatpush.bf16.msra.mxu0 %v81_v23  ;;  %107 = vmatpush.bf16.msra.mxu1 %v84_v24  ;;  %v681_v29 = vor.u32 %v787_v22, %v680_v21  ;;  %v786_v30 = vld [vmem:[#allocation2 + $0xe4] sm:$0xf]  ;;  %v608_v32 = vld [vmem:[#allocation2 + $0x50] sm:$0xf] }
  0x13   :  { %v682_v31 = vld [vmem:[#allocation2 + $0xe8] sm:$0xf0]  ;;  %v621_v33 = vor.u32 %v770_v27, %v618_v28  ;;  %v769_v35 = vld [vmem:[#allocation2 + $0x54] sm:$0xf0]  ;;  %v672_v36 = vld [vmem:[#allocation2 + $0xd0] sm:$0xf] }
  0x14   :  { %v685_v34 = vor.u32 %v786_v30, %v682_v31  ;;  %v785_v37 = vld [vmem:[#allocation2 + $0xd4] sm:$0xf0]  ;;  %319 = vmatpush.bf16.msra.mxu2 %v617_v26  ;;  %v609_v38 = vor.u32 %v769_v35, %v608_v32  ;;  %v768_v39 = vld [vmem:[#allocation2 + $0x54] sm:$0xf]  ;;  %v610_v40 = vld [vmem:[#allocation2 + $0x58] sm:$0xf0] }
  0x15   :  { %v784_v41 = vld [vmem:[#allocation2 + $0xd4] sm:$0xf]  ;;  %564 = vmatmul.msk.bf16.vlgmr.msra.gmra.mxu0 %vm75_vm1, %v62_v25  ;;  %565 = vmatmul.msk.bf16.vlgmr.msra.gmra.mxu1 %vm75_vm1, %v62_v25  ;;  %v674_v42 = vld [vmem:[#allocation2 + $0xd8] sm:$0xf0]  ;;  %v600_v43 = vld [vmem:[#allocation2 + $0x40] sm:$0xf]  ;;  %v673_v45 = vor.u32 %v785_v37, %v672_v36  ;;  %v613_v47 = vor.u32 %v768_v39, %v610_v40 }
  0x16   :  { %346 = vmatpush.bf16.msrb.mxu0 %v629_v15  ;;  %360 = vmatpush.bf16.msrb.mxu1 %v693_v19  ;;  %v767_v44 = vld [vmem:[#allocation2 + $0x44] sm:$0xf0]  ;;  %v664_v46 = vld [vmem:[#allocation2 + $0xc0] sm:$0xf]  ;;  %v677_v48 = vor.u32 %v784_v41, %v674_v42  ;;  %v766_v50 = vld [vmem:[#allocation2 + $0x44] sm:$0xf] }
  0x17   :  { %333 = vmatpush.bf16.msra.mxu3 %v681_v29  ;;  %v783_v49 = vld [vmem:[#allocation2 + $0xc4] sm:$0xf0]  ;;  %v602_v51 = vld [vmem:[#allocation2 + $0x48] sm:$0xf0]  ;;  %v601_v52 = vor.u32 %v767_v44, %v600_v43  ;;  %v782_v53 = vld [vmem:[#allocation2 + $0xc4] sm:$0xf] }
  0x18   :  { %320 = vmatpush.bf16.msra.mxu2 %v609_v38  ;;  %v666_v54 = vld [vmem:[#allocation2 + $0xc8] sm:$0xf0]  ;;  %v665_v55 = vor.u32 %v783_v49, %v664_v46  ;;  %v605_v56 = vor.u32 %v766_v50, %v602_v51  ;;  %v592_v58 = vld [vmem:[#allocation2 + $0x30] sm:$0xf]  ;;  %v765_v59 = vld [vmem:[#allocation2 + $0x34] sm:$0xf0] }
  0x19   :  { %v669_v57 = vor.u32 %v782_v53, %v666_v54  ;;  %v656_v60 = vld [vmem:[#allocation2 + $0xb0] sm:$0xf]  ;;  %v593_v61 = vor.u32 %v765_v59, %v592_v58  ;;  %v781_v62 = vld [vmem:[#allocation2 + $0xb4] sm:$0xf0]  ;;  %v764_v63 = vld [vmem:[#allocation2 + $0x34] sm:$0xf] }
  0x1a   :  { %347 = vmatpush.bf16.msrb.mxu0 %v621_v33  ;;  %361 = vmatpush.bf16.msrb.mxu1 %v685_v34  ;;  %v594_v0 = vld [vmem:[#allocation2 + $0x38] sm:$0xf0]  ;;  %v657_v1 = vor.u32 %v781_v62, %v656_v60  ;;  %v780_v3 = vld [vmem:[#allocation2 + $0xb4] sm:$0xf]  ;;  %v584_v6 = vld [vmem:[#allocation2 + $0x20] sm:$0xf] }
  0x1b   :  { %334 = vmatpush.bf16.msra.mxu3 %v673_v45  ;;  %v597_v2 = vor.u32 %v764_v63, %v594_v0  ;;  %v658_v4 = vld [vmem:[#allocation2 + $0xb8] sm:$0xf0]  ;;  %v763_v7 = vld [vmem:[#allocation2 + $0x24] sm:$0xf0]  ;;  %v648_v9 = vld [vmem:[#allocation2 + $0xa0] sm:$0xf] }
  0x1c   :  { %321 = vmatpush.bf16.msra.mxu2 %v601_v52  ;;  %v661_v5 = vor.u32 %v780_v3, %v658_v4  ;;  %v585_v8 = vor.u32 %v763_v7, %v584_v6  ;;  %v779_v10 = vld [vmem:[#allocation2 + $0xa4] sm:$0xf0]  ;;  %v762_v11 = vld [vmem:[#allocation2 + $0x24] sm:$0xf]  ;;  %v586_v13 = vld [vmem:[#allocation2 + $0x28] sm:$0xf0] }
  0x1d   :  { %v649_v12 = vor.u32 %v779_v10, %v648_v9  ;;  %v778_v14 = vld [vmem:[#allocation2 + $0xa4] sm:$0xf]  ;;  %v650_v15 = vld [vmem:[#allocation2 + $0xa8] sm:$0xf0]  ;;  %v589_v16 = vor.u32 %v762_v11, %v586_v13  ;;  %v576_v18 = vld [vmem:[#allocation2 + $0x10] sm:$0xf] }
  0x1e   :  { %348 = vmatpush.bf16.msrb.mxu0 %v613_v47  ;;  %362 = vmatpush.bf16.msrb.mxu1 %v677_v48  ;;  %v653_v17 = vor.u32 %v778_v14, %v650_v15  ;;  %v761_v19 = vld [vmem:[#allocation2 + $0x14] sm:$0xf0]  ;;  %v640_v20 = vld [vmem:[#allocation2 + $0x90] sm:$0xf]  ;;  %v760_v23 = vld [vmem:[#allocation2 + $0x14] sm:$0xf] }
  0x1f   :  { %335 = vmatpush.bf16.msra.mxu3 %v665_v55  ;;  %v577_v21 = vor.u32 %v761_v19, %v576_v18  ;;  %v777_v22 = vld [vmem:[#allocation2 + $0x94] sm:$0xf0]  ;;  %v578_v24 = vld [vmem:[#allocation2 + $0x18] sm:$0xf0]  ;;  %v776_v27 = vld [vmem:[#allocation2 + $0x94] sm:$0xf] }
  0x20   :  { %322 = vmatpush.bf16.msra.mxu2 %v593_v61  ;;  %v641_v25 = vor.u32 %v777_v22, %v640_v20  ;;  %v581_v26 = vor.u32 %v760_v23, %v578_v24  ;;  %v642_v28 = vld [vmem:[#allocation2 + $0x98] sm:$0xf0]  ;;  %v568_v30 = vld [vmem:[#allocation2] sm:$0xf]  ;;  %v759_v31 = vld [vmem:[#allocation2 + $0x4] sm:$0xf0] }
  0x21   :  { %v645_v29 = vor.u32 %v776_v27, %v642_v28  ;;  %v632_v32 = vld [vmem:[#allocation2 + $0x80] sm:$0xf]  ;;  %v569_v33 = vor.u32 %v759_v31, %v568_v30  ;;  %v775_v34 = vld [vmem:[#allocation2 + $0x84] sm:$0xf0]  ;;  %v758_v35 = vld [vmem:[#allocation2 + $0x4] sm:$0xf] }
  0x22   :  { %349 = vmatpush.bf16.msrb.mxu0 %v605_v56  ;;  %363 = vmatpush.bf16.msrb.mxu1 %v669_v57  ;;  %v570_v36 = vld [vmem:[#allocation2 + $0x8] sm:$0xf0]  ;;  %v633_v37 = vor.u32 %v775_v34, %v632_v32  ;;  %v774_v39 = vld [vmem:[#allocation2 + $0x84] sm:$0xf]  ;;  %v805_v42 = vld [vmem:[#allocation5 + $0x78] sm:$0xff]  ;;  %s548_s22 = sshll.u32 %s903_s21, 4  ;;  %s549_s22 = int_to_ptr.vmem [resolvable:$true] %s548_s22 }
  0x23   :  { %336 = vmatpush.bf16.msra.mxu3 %v657_v1  ;;  %v573_v38 = vor.u32 %v758_v35, %v570_v36  ;;  %v634_v40 = vld [vmem:[#allocation2 + $0x88] sm:$0xf0]  ;;  %v797_v43 = vld [vmem:[#allocation5 + $0x38] sm:$0xff]  ;;  %v804_v44 = vld [vmem:[#allocation5 + $0x70] sm:$0xff]  ;;  %s550_s25 = sshll.u32 %s988_s7, 4  ;;  %s551_s25 = int_to_ptr.hbm [resolvable:$true] %s550_s25 }
  0x24   :  { %323 = vmatpush.bf16.msra.mxu2 %v585_v8  ;;  %v637_v41 = vor.u32 %v774_v39, %v634_v40  ;;  %v796_v45 = vld [vmem:[#allocation5 + $0x30] sm:$0xff]  ;;  %v803_v46 = vld [vmem:[#allocation5 + $0x68] sm:$0xff]  ;;  %v802_v47 = vld [vmem:[#allocation5 + $0x60] sm:$0xff] }
  0x25   :  { %v64_v48 = vld [vmem:[%s983_s2] sm:$0x3]  ;;  %v795_v1 = vld [vmem:[#allocation5 + $0x28] sm:$0xff]  ;;  %v800_v4 = vld [vmem:[#allocation5 + $0x50] sm:$0xff] }
  0x26   :  { %350 = vmatpush.bf16.msrb.mxu0 %v597_v2  ;;  %364 = vmatpush.bf16.msrb.mxu1 %v661_v5  ;;  %v66_v51 = vperm.slane %v64_v48, 0  ;;  %v67_v52 = vperm.slane %v64_v48, 1  ;;  %v801_v2 = vld [vmem:[#allocation5 + $0x58] sm:$0xff]  ;;  %v794_v3 = vld [vmem:[#allocation5 + $0x20] sm:$0xff]  ;;  %v799_v6 = vld [vmem:[#allocation5 + $0x48] sm:$0xff] }
  0x27   :  { %337 = vmatpush.bf16.msra.mxu3 %v649_v12  ;;  %v793_v5 = vld [vmem:[#allocation5 + $0x18] sm:$0xff]  ;;  %v792_v7 = vld [vmem:[#allocation5 + $0x10] sm:$0xff]  ;;  %v798_v8 = vld [vmem:[#allocation5 + $0x40] sm:$0xff] }
  0x28   :  { %324 = vmatpush.bf16.msra.mxu2 %v577_v21  ;;  %v791_v9 = vld [vmem:[#allocation5 + $0x8] sm:$0xff]  ;;  %v790_v10 = vld [vmem:[#allocation5] sm:$0xff] }
  0x29   :  { %v152_v11 = vld [vmem:[%s985_s4] sm:$0x3] }
  0x2a   :  { %351 = vmatpush.bf16.msrb.mxu0 %v589_v16  ;;  %365 = vmatpush.bf16.msrb.mxu1 %v653_v17  ;;  %v155_v14 = vperm.slane %v152_v11, 1  ;;  %v154_v18 = vperm.slane %v152_v11, 0 }
  0x2b   :  { %338 = vmatpush.bf16.msra.mxu3 %v641_v25 }
  0x2c   :  { %325 = vmatpush.bf16.msra.mxu2 %v569_v33 }
  0x2e   :  { %352 = vmatpush.bf16.msrb.mxu0 %v581_v26  ;;  %366 = vmatpush.bf16.msrb.mxu1 %v645_v29 }
  0x2f   :  { %339 = vmatpush.bf16.msra.mxu3 %v633_v37 }
  0x30   :  { %512 = vmatpush.bf16.msrb.mxu2 %v797_v43 }
  0x32   :  { %353 = vmatpush.bf16.msrb.mxu0 %v573_v38  ;;  %367 = vmatpush.bf16.msrb.mxu1 %v637_v41  ;;  %v818_v38 = vld [vmem:[%s987_s6] ss:$0 sm:$0xff] }
  0x33   :  { %526 = vmatpush.bf16.msrb.mxu3 %v805_v42 }
  0x34   :  { %513 = vmatpush.bf16.msrb.mxu2 %v796_v45 }
  0x37   :  { %527 = vmatpush.bf16.msrb.mxu3 %v804_v44 }
  0x38   :  { %514 = vmatpush.bf16.msrb.mxu2 %v795_v1 }
  0x3b   :  { %528 = vmatpush.bf16.msrb.mxu3 %v803_v46 }
  0x3c   :  { %515 = vmatpush.bf16.msrb.mxu2 %v794_v3 }
  0x3f   :  { %529 = vmatpush.bf16.msrb.mxu3 %v802_v47 }
  0x40   :  { %516 = vmatpush.bf16.msrb.mxu2 %v793_v5 }
  0x43   :  { %530 = vmatpush.bf16.msrb.mxu3 %v801_v2 }
  0x44   :  { %517 = vmatpush.bf16.msrb.mxu2 %v792_v7 }
  0x47   :  { %531 = vmatpush.bf16.msrb.mxu3 %v800_v4 }
  0x48   :  { %518 = vmatpush.bf16.msrb.mxu2 %v791_v9 }
  0x4b   :  { %532 = vmatpush.bf16.msrb.mxu3 %v799_v6 }
  0x4c   :  { %519 = vmatpush.bf16.msrb.mxu2 %v790_v10 }
  0x4f   :  { %533 = vmatpush.bf16.msrb.mxu3 %v798_v8 }
  0x92   :  { %v95_v49 = vpop.f32.mrf.mxu0  ;;  %v109_v50 = vpop.f32.mrf.mxu1 }
  0x93   :  { %v96_v53 = vadd.f32 %v95_v49, %v66_v51  ;;  %v110_v54 = vadd.f32 %v109_v50, %v67_v52 }
  0x95   :  { %v114_v59 = vmax.f32 %v96_v53, 0.0  ;;  %v115_v60 = vmax.f32 %v110_v54, 0.0 }
  0x9a   :  { %v97_v55 = vpop.f32.mrf.mxu0  ;;  %v111_v56 = vpop.f32.mrf.mxu1 }
  0x9b   :  { %v98_v57 = vadd.f32 %v97_v55, %v66_v51  ;;  %v112_v58 = vadd.f32 %v111_v56, %v67_v52 }
  0x9d   :  { %v116_v61 = vmax.f32 %v98_v57, 0.0  ;;  %v117_v62 = vmax.f32 %v112_v58, 0.0 }
  0x9f   :  { %v118_v63 = vpack.c.bf16 %v116_v61, %v114_v59  ;;  %v119_v0 = vpack.c.bf16 %v117_v62, %v115_v60 }
  0xa1   :  { %326 = vmatmul.bf16.vlgmr.msra.gmra.mxu2 %v118_v63  ;;  %340 = vmatmul.bf16.vlgmr.msra.gmra.mxu3 %v119_v0 }
  0xa2   :  { %354 = vmatmul.bf16.vlgmr.msrb.gmra.mxu0 %v118_v63  ;;  %368 = vmatmul.bf16.vlgmr.msrb.gmra.mxu1 %v119_v0 }
 0x11f   :  { %v355_v12 = vpop.f32.mrf.mxu0  ;;  %v369_v13 = vpop.f32.mrf.mxu1 }
 0x120   :  { %v356_v15 = vadd.f32 %v355_v12, %v155_v14 }
 0x122   :  { %v370_v20 = vadd.f32 %v369_v13, %v356_v15 }
 0x124   :  { %v327_v16 = vpop.f32.mrf.mxu2  ;;  %v341_v17 = vpop.f32.mrf.mxu3  ;;  %v375_v25 = vmax.f32 %v370_v20, 0.0 }
 0x125   :  { %v328_v22 = vadd.f32 %v327_v16, %v154_v18 }
 0x127   :  { %v357_v19 = vpop.f32.mrf.mxu0  ;;  %v371_v23 = vpop.f32.mrf.mxu1  ;;  %v342_v28 = vadd.f32 %v341_v17, %v328_v22 }
 0x128   :  { %v358_v21 = vadd.f32 %v357_v19, %v155_v14 }
 0x129   :  { %v374_v33 = vmax.f32 %v342_v28, 0.0 }
 0x12a   :  { %v372_v24 = vadd.f32 %v371_v23, %v358_v21 }
 0x12c   :  { %v377_v26 = vmax.f32 %v372_v24, 0.0  ;;  %v329_v27 = vpop.f32.mrf.mxu2  ;;  %v343_v31 = vpop.f32.mrf.mxu3 }
 0x12d   :  { %v330_v29 = vadd.f32 %v329_v27, %v154_v18 }
 0x12e   :  { %v379_v30 = vpack.c.bf16 %v377_v26, %v375_v25 }
 0x12f   :  { %v344_v32 = vadd.f32 %v343_v31, %v330_v29 }
 0x130   :  { %534 = vmatmul.bf16.vlgmr.msrb.gmra.mxu3 %v379_v30 }
 0x131   :  { %v376_v34 = vmax.f32 %v344_v32, 0.0 }
 0x133   :  { %v378_v35 = vpack.c.bf16 %v376_v34, %v374_v33 }
 0x135   :  { %520 = vmatmul.bf16.vlgmr.msrb.gmra.mxu2 %v378_v35 }
 0x1b3   :  { %v535_v36 = vpop.f32.mrf.mxu3 }
 0x1b8   :  { %v521_v37 = vpop.f32.mrf.mxu2 }
 0x1b9   :  { %v522_v39 = vadd.f32 %v818_v38, %v521_v37 }
 0x1bb   :  { %v537_v42 = vpop.f32.mrf.mxu3  ;;  %v536_v43 = vadd.f32 %v535_v36, %v522_v39 }
 0x1c0   :  { %v523_v40 = vpop.f32.mrf.mxu2 }
 0x1c1   :  { %v524_v41 = vadd.f32 %v818_v38, %v523_v40 }
 0x1c3   :  { %v538_v44 = vadd.f32 %v537_v42, %v524_v41 }
 0x1c5   :  { %v809_v45 = vpack.c.bf16 %v538_v44, %v536_v43 }
 0x1c7   :  { %810 = vst [vmem:[#allocation7] sm:$0xff] %v809_v45  }
 0x1c8   :  { %556 = dma.vmem_to_hbm [thread:$0]  %s549_s22, 128, %s551_s25, [#allocation4], %s901_s13, %s901_s13, %s902_s14  }
 0x1c9   :  { %895 = dma.done.wait [#allocation4], 128  }
 0x1ca   :  { %896 = vsyncadd [#allocation4], 4294967168 }
 0x1cb   :  { %561 = vsyncpa [#allocation3], 1 }
 0x1cc   :  { %562 = vsyncpa [#allocation6], 1 }
 0x1cd   :  { %563 = vsyncpa [#allocation4], 1 }

</bundles_post_ra>
